<compile_context>
chip_gen: v7x
topology: tpu7x:2x2x1
jax: 0.10.0
libtpu: 0.0.40
codegen_flags: <defaults>
</compile_context>

<pallas_src>
import functools
import math

import jax
import jax.numpy as jnp
from jax.experimental import pallas as pl
from jax.experimental.pallas import tpu as pltpu


def _pe_combine_kernel(tab_x_ref, tab_y_ref, out_ref):
    """Combine per-axis sin/cos tables into one row-block of the PE map.

    tab_x_ref: (2, F, 1, W) float32   [sin(A); cos(A)],   A[f, c] = 2*pi*gx[f]*x[c]
    tab_y_ref: (2, F, th, 1) float32  [sin(B); cos(B)],   B[f, r] = 2*pi*gy[f]*y[r]
               (row-block of the full (2, F, H, 1) table)
    out_ref:   (2F, th, W) float32    rows [0:F] = sin, rows [F:2F] = cos
    """
    F = tab_x_ref.shape[1]

    sin_x = tab_x_ref[0]  # (F, 1, W)  -- broadcasts along sublanes (rows)
    cos_x = tab_x_ref[1]
    sin_y = tab_y_ref[0]  # (F, th, 1) -- broadcasts along lanes (cols)
    cos_y = tab_y_ref[1]

    # Angle-addition identities: all VPU multiplies/adds on packed vregs.
    out_ref[:F] = sin_x * cos_y + cos_x * sin_y   # sin(A + B)
    out_ref[F:] = cos_x * cos_y - sin_x * sin_y   # cos(A + B)


def _choose_row_block(H: int, target_steps: int = 4) -> int:
    """Row-block height: multiple of 8 dividing H, aiming for >= target_steps
    grid steps (dual-TC sharding + DMA/compute overlap); falls back to full H."""
    if H % 8 != 0 or H <= 8:
        return H
    th = max(8, (H // target_steps) // 8 * 8)
    while H % th != 0:
        th -= 8
    return th


@functools.partial(jax.jit, static_argnames=("image_embedding_size",))
def positional_embedding(gaussian_matrix: jax.Array, image_embedding_size):
    """Equivalent of PositionalEmbedding.forward().

    gaussian_matrix: (2, num_pos_feats) float32
    returns: (1, embed_dim, H, W) float32 with embed_dim == 2 * num_pos_feats
    """
    H, W = image_embedding_size
    g = gaussian_matrix.astype(jnp.float32)
    F = g.shape[1]
    C = 2 * F
    two_pi = jnp.float32(2.0 * math.pi)

    # Normalized grid coords in [0,1] (matches cumsum(ones)-0.5 of the module),
    # mapped to [-1, 1].
    x = (jnp.arange(W, dtype=jnp.float32) + 0.5) * (2.0 / W) - 1.0  # (W,)
    y = (jnp.arange(H, dtype=jnp.float32) + 0.5) * (2.0 / H) - 1.0  # (H,)

    # Tiny per-axis frequency tables: 2*F*(H+W) transcendentals total.
    ax = two_pi * (g[0, :, None] * x[None, :])                      # (F, W)
    ay = two_pi * (g[1, :, None] * y[None, :])                      # (F, H)
    tab_x = jnp.stack([jnp.sin(ax), jnp.cos(ax)])[:, :, None, :]    # (2, F, 1, W)
    tab_y = jnp.stack([jnp.sin(ay), jnp.cos(ay)])[..., None]        # (2, F, H, 1)

    th = _choose_row_block(H)
    grid = (H // th,)

    pe = pl.pallas_call(
        _pe_combine_kernel,
        out_shape=jax.ShapeDtypeStruct((C, H, W), jnp.float32),
        grid=grid,
        in_specs=[
            # Column table: tiny, fully resident every step.
            pl.BlockSpec((2, F, 1, W), lambda i: (0, 0, 0, 0)),
            # Row table: one row-block per grid step.
            pl.BlockSpec((2, F, th, 1), lambda i: (0, 0, i, 0)),
        ],
        # Final channel-first layout written directly; no post-kernel relayout.
        out_specs=pl.BlockSpec((C, th, W), lambda i: (0, i, 0)),
        compiler_params=pltpu.CompilerParams(
            dimension_semantics=("parallel",),
        ),
    )(tab_x, tab_y)

    # Leading unit dim only: pure metadata, no data movement.
    # TODO(synk): for tiny shipped configs (e.g. 16x16, F=16) this standalone
    # call is launch-bound; cache the (static) PE map or fuse into the consumer.
    return pe[None]


if __name__ == "__main__":
    # Module config: embed_dim=32, image_embedding_size=(16, 16)
    embed_dim = 32
    image_embedding_size = (16, 16)
    num_pos_feats = embed_dim // 2

    # Deterministic "buffer" init (scale=1.0 * randn((2, num_pos_feats)))
    key = jax.random.PRNGKey(0)
    gaussian_matrix = jax.random.normal(key, (2, num_pos_feats), dtype=jnp.float32)

    out = positional_embedding(gaussian_matrix, image_embedding_size)
    out = jax.block_until_ready(out)

    H, W = image_embedding_size
    assert out.shape == (1, embed_dim, H, W), out.shape

    # Pure-JAX reference check (same math as the PyTorch module).
    y = (jnp.arange(H, dtype=jnp.float32) + 0.5) / H
    x = (jnp.arange(W, dtype=jnp.float32) + 0.5) / W
    coords = jnp.stack(jnp.meshgrid(x, y, indexing="xy"), axis=-1)  # (H, W, 2) as (x, y)
    coords = 2.0 * coords - 1.0
    proj = 2.0 * jnp.pi * (coords @ gaussian_matrix)
    ref = jnp.concatenate([jnp.sin(proj), jnp.cos(proj)], axis=-1)
    ref = jnp.transpose(ref, (2, 0, 1))[None]
    assert jnp.allclose(out, ref, atol=1e-4, rtol=1e-4), float(jnp.max(jnp.abs(out - ref)))

    print("KERNEL_OK")
</pallas_src>

<mosaic_0001>
module attributes {stable_mosaic.version = 11 : i64} {
  func.func @_pe_combine_kernel(%arg0: i32, %arg1: memref<2x16x1x16xf32, #tpu.memory_space<vmem>>, %arg2: memref<2x16x8x1xf32, #tpu.memory_space<vmem>>, %arg3: memref<32x8x16xf32, #tpu.memory_space<vmem>>) attributes {dimension_semantics = [#tpu.dimension_semantics<parallel>], iteration_bounds = array<i64: 2>, scalar_prefetch = 0 : i64, scratch_operands = 0 : i64, tpu.core_type = #tpu.core_type<tc>, window_params = [{pipeline_mode = #tpu.pipeline_mode<synchronous>, transform_indices = @transform_0, window_bounds = array<i64: 2, 16, 1, 16>}, {transform_indices = @transform_1, window_bounds = array<i64: 2, 16, 8, 1>}, {transform_indices = @transform_2, window_bounds = array<i64: 32, 8, 16>}]} {
    %c0 = arith.constant 0 : index
    %c0_0 = arith.constant 0 : index
    %c0_1 = arith.constant 0 : index
    %c0_2 = arith.constant 0 : index
    %0 = vector.load %arg1[%c0, %c0_0, %c0_1, %c0_2] : memref<2x16x1x16xf32, #tpu.memory_space<vmem>>, vector<1x16x1x16xf32>
    %1 = vector.shape_cast %0 : vector<1x16x1x16xf32> to vector<16x1x16xf32>
    %c1 = arith.constant 1 : index
    %c0_3 = arith.constant 0 : index
    %c0_4 = arith.constant 0 : index
    %c0_5 = arith.constant 0 : index
    %2 = vector.load %arg1[%c1, %c0_3, %c0_4, %c0_5] : memref<2x16x1x16xf32, #tpu.memory_space<vmem>>, vector<1x16x1x16xf32>
    %3 = vector.shape_cast %2 : vector<1x16x1x16xf32> to vector<16x1x16xf32>
    %c0_6 = arith.constant 0 : index
    %c0_7 = arith.constant 0 : index
    %c0_8 = arith.constant 0 : index
    %c0_9 = arith.constant 0 : index
    %4 = vector.load %arg2[%c0_6, %c0_7, %c0_8, %c0_9] : memref<2x16x8x1xf32, #tpu.memory_space<vmem>>, vector<1x16x8x1xf32>
    %5 = vector.shape_cast %4 : vector<1x16x8x1xf32> to vector<16x8x1xf32>
    %c1_10 = arith.constant 1 : index
    %c0_11 = arith.constant 0 : index
    %c0_12 = arith.constant 0 : index
    %c0_13 = arith.constant 0 : index
    %6 = vector.load %arg2[%c1_10, %c0_11, %c0_12, %c0_13] : memref<2x16x8x1xf32, #tpu.memory_space<vmem>>, vector<1x16x8x1xf32>
    %7 = vector.shape_cast %6 : vector<1x16x8x1xf32> to vector<16x8x1xf32>
    %8 = vector.broadcast %1 : vector<16x1x16xf32> to vector<16x8x16xf32>
    %9 = vector.broadcast %7 : vector<16x8x1xf32> to vector<16x8x16xf32>
    %10 = arith.mulf %8, %9 : vector<16x8x16xf32>
    %11 = vector.broadcast %3 : vector<16x1x16xf32> to vector<16x8x16xf32>
    %12 = vector.broadcast %5 : vector<16x8x1xf32> to vector<16x8x16xf32>
    %13 = arith.mulf %11, %12 : vector<16x8x16xf32>
    %14 = arith.addf %10, %13 : vector<16x8x16xf32>
    %c0_14 = arith.constant 0 : index
    %c0_15 = arith.constant 0 : index
    %c0_16 = arith.constant 0 : index
    %15 = vector.load %arg3[%c0_14, %c0_15, %c0_16] : memref<32x8x16xf32, #tpu.memory_space<vmem>>, vector<16x8x16xf32>
    tpu.vector_store %arg3[%c0_14, %c0_15, %c0_16], %14 {strides = array<i32>} : memref<32x8x16xf32, #tpu.memory_space<vmem>>, vector<16x8x16xf32>,
    %16 = vector.broadcast %3 : vector<16x1x16xf32> to vector<16x8x16xf32>
    %17 = vector.broadcast %7 : vector<16x8x1xf32> to vector<16x8x16xf32>
    %18 = arith.mulf %16, %17 : vector<16x8x16xf32>
    %19 = vector.broadcast %1 : vector<16x1x16xf32> to vector<16x8x16xf32>
    %20 = vector.broadcast %5 : vector<16x8x1xf32> to vector<16x8x16xf32>
    %21 = arith.mulf %19, %20 : vector<16x8x16xf32>
    %22 = arith.subf %18, %21 : vector<16x8x16xf32>
    %c16 = arith.constant 16 : index
    %c0_17 = arith.constant 0 : index
    %c0_18 = arith.constant 0 : index
    %23 = vector.load %arg3[%c16, %c0_17, %c0_18] : memref<32x8x16xf32, #tpu.memory_space<vmem>>, vector<16x8x16xf32>
    tpu.vector_store %arg3[%c16, %c0_17, %c0_18], %22 {strides = array<i32>} : memref<32x8x16xf32, #tpu.memory_space<vmem>>, vector<16x8x16xf32>,
    return
  }
  func.func @transform_0(%arg0: i32) -> (i32, i32, i32, i32) {
    %c0_i32 = arith.constant 0 : i32
    %c0_i32_0 = arith.constant 0 : i32
    %c0_i32_1 = arith.constant 0 : i32
    %c0_i32_2 = arith.constant 0 : i32
    %c0_i32_3 = arith.constant 0 : i32
    return %c0_i32, %c0_i32_0, %c0_i32_1, %c0_i32_2 : i32, i32, i32, i32
  }
  func.func @transform_1(%arg0: i32) -> (i32, i32, i32, i32) {
    %c0_i32 = arith.constant 0 : i32
    %c0_i32_0 = arith.constant 0 : i32
    %c0_i32_1 = arith.constant 0 : i32
    %c0_i32_2 = arith.constant 0 : i32
    return %c0_i32, %c0_i32_0, %arg0, %c0_i32_1 : i32, i32, i32, i32
  }
  func.func @transform_2(%arg0: i32) -> (i32, i32, i32) {
    %c0_i32 = arith.constant 0 : i32
    %c0_i32_0 = arith.constant 0 : i32
    %c0_i32_1 = arith.constant 0 : i32
    return %c0_i32, %arg0, %c0_i32_0 : i32, i32, i32
  }
}

</mosaic_0001>

<bundles_post_ra>
// kernel: positional_embedding.1
= control target key start
LH: loop header
LB: loop body
LE: loop exit
PB: predicated region body
PF: predicated region fallthrough
CT: control target
= control target key end

     0   :  { %s1225_s9 = smov 0   ;;  %s1227_s10 = smov 0   ;;  %s1659_s0 = inlined_call_operand.vmem [shape: f32[2,16,1,16], index: 0, kind: input, shape index: {}]   ;;  %s1660_s1 = inlined_call_operand.vmem [shape: f32[2,16,16,1], index: 1, kind: input, shape index: {}]   ;;  %s1661_s2 = inlined_call_operand.vmem [shape: f32[32,16,16], index: 2, kind: output, shape index: {}]  }
   0x1   :  { %s1229_s11 = smov 0  }
   0x2 LB: > { %s1065_s12 = sadd.s32 4294967295, %s1207_s11   ;;  %s1242_s13 = sadd.s32 1, %s1207_s11   ;;  %s1207_s11 = sphi %s1229_s11, %s1665_s11   ;;  %s1203_s10 = sphi %s1227_s10, %s1664_s10   ;;  %s1199_s9 = sphi %s1225_s9, %s1663_s9  }
   0x3   : > { %s37_s14 = ssub.s32 %s1207_s11, %s1242_s13  ;;  %s40_s15 = sadd.s32 1, %s1203_s10 }
   0x4   : > { %p38_p0 = scmp.eq.s32.totalorder %s37_s14, 0  ;;  %p47_p1 = scmp.ne.s32.totalorder %s1203_s10, %s1199_s9 }
   0x5   : > { %p48_p2 = scmp.eq.s32.totalorder %s1207_s11, 0  ;;  %p77_p3 = scmp.eq.s32.totalorder %s1065_s12, 1 }
   0x6   : > { %s1253_s16 = scalar_select %p38_p0, %s1203_s10, %s40_s15  }
   0x7   : > { %p49_p4 = por %p48_p2, %p47_p1  ;;  %p1255_p5 = por %p77_p3, %p47_p1 }
   0x8   : > { %p1068_p6 = scmp.ge.s32.totalorder %s1207_s11, 2 }
   0xa   : > { %102 = sbr.rel (%p1068_p6) target bundleno = 37 (0x25), region = 20 }
  0x11   : > { %105 = sbr.rel (!%p49_p4) target bundleno = 37 (0x25), region = 24  ;;  %s107_s18 = sand.u32 (%p49_p4), 1, %s1203_s10  }
  0x12   : > { %s1070_s19 = sshll.u32 (%p49_p4), %s1207_s11, 3  ;;  %s1069_s20 = sshll.u32 (%p49_p4), %s107_s18, 8 }
  0x13   : > { %s1265_s23 = scalar_lea.vmem (%p49_p4), %s1660_s1, %s1070_s19  ;;  %s1270_s24 = scalar_lea.vmem (%p49_p4), [#allocation2], %s1069_s20 }
  0x14   : > { %v201_v0 = vld [vmem:[%s1265_s23] sm:$0xff] (%p49_p4)  ;;  %v203_v1 = vld [vmem:[%s1265_s23 + $0x10] sm:$0xff] (%p49_p4) }
  0x15   : > { %v205_v2 = vld [vmem:[%s1265_s23 + $0x20] sm:$0xff] (%p49_p4)  ;;  %202 = vst [vmem:[%s1270_s24] sm:$0xff] (%p49_p4), %v201_v0  ;;  %204 = vst [vmem:[%s1270_s24 + $0x8] sm:$0xff] (%p49_p4), %v203_v1  ;;  %v207_v3 = vld [vmem:[%s1265_s23 + $0x30] sm:$0xff] (%p49_p4) }
  0x16   : > { %206 = vst [vmem:[%s1270_s24 + $0x10] sm:$0xff] (%p49_p4), %v205_v2  ;;  %v209_v4 = vld [vmem:[%s1265_s23 + $0x40] sm:$0xff] (%p49_p4)  ;;  %v211_v5 = vld [vmem:[%s1265_s23 + $0x50] sm:$0xff] (%p49_p4)  ;;  %208 = vst [vmem:[%s1270_s24 + $0x18] sm:$0xff] (%p49_p4), %v207_v3 }
  0x17   : > { %210 = vst [vmem:[%s1270_s24 + $0x20] sm:$0xff] (%p49_p4), %v209_v4  ;;  %212 = vst [vmem:[%s1270_s24 + $0x28] sm:$0xff] (%p49_p4), %v211_v5  ;;  %v213_v6 = vld [vmem:[%s1265_s23 + $0x60] sm:$0xff] (%p49_p4)  ;;  %v215_v7 = vld [vmem:[%s1265_s23 + $0x70] sm:$0xff] (%p49_p4) }
  0x18   : > { %v217_v8 = vld [vmem:[%s1265_s23 + $0x80] sm:$0xff]  ;;  %214 = vst [vmem:[%s1270_s24 + $0x30] sm:$0xff] %v213_v6  ;;  %216 = vst [vmem:[%s1270_s24 + $0x38] sm:$0xff] %v215_v7  ;;  %v219_v9 = vld [vmem:[%s1265_s23 + $0x90] sm:$0xff] }
  0x19   : > { %218 = vst [vmem:[%s1270_s24 + $0x40] sm:$0xff] %v217_v8  ;;  %v221_v10 = vld [vmem:[%s1265_s23 + $0xa0] sm:$0xff]  ;;  %v223_v11 = vld [vmem:[%s1265_s23 + $0xb0] sm:$0xff]  ;;  %220 = vst [vmem:[%s1270_s24 + $0x48] sm:$0xff] %v219_v9 }
  0x1a   : > { %222 = vst [vmem:[%s1270_s24 + $0x50] sm:$0xff] %v221_v10  ;;  %224 = vst [vmem:[%s1270_s24 + $0x58] sm:$0xff] %v223_v11  ;;  %v225_v12 = vld [vmem:[%s1265_s23 + $0xc0] sm:$0xff]  ;;  %v227_v13 = vld [vmem:[%s1265_s23 + $0xd0] sm:$0xff] }
  0x1b   : > { %v229_v14 = vld [vmem:[%s1265_s23 + $0xe0] sm:$0xff]  ;;  %226 = vst [vmem:[%s1270_s24 + $0x60] sm:$0xff] %v225_v12  ;;  %228 = vst [vmem:[%s1270_s24 + $0x68] sm:$0xff] %v227_v13  ;;  %v231_v15 = vld [vmem:[%s1265_s23 + $0xf0] sm:$0xff] }
  0x1c   : > { %230 = vst [vmem:[%s1270_s24 + $0x70] sm:$0xff] %v229_v14  ;;  %v233_v16 = vld [vmem:[%s1265_s23 + $0x100] sm:$0xff]  ;;  %v235_v17 = vld [vmem:[%s1265_s23 + $0x110] sm:$0xff]  ;;  %232 = vst [vmem:[%s1270_s24 + $0x78] sm:$0xff] %v231_v15 }
  0x1d   : > { %234 = vst [vmem:[%s1270_s24 + $0x80] sm:$0xff] %v233_v16  ;;  %236 = vst [vmem:[%s1270_s24 + $0x88] sm:$0xff] %v235_v17  ;;  %v237_v18 = vld [vmem:[%s1265_s23 + $0x120] sm:$0xff]  ;;  %v239_v19 = vld [vmem:[%s1265_s23 + $0x130] sm:$0xff] }
  0x1e   : > { %v241_v20 = vld [vmem:[%s1265_s23 + $0x140] sm:$0xff]  ;;  %238 = vst [vmem:[%s1270_s24 + $0x90] sm:$0xff] %v237_v18  ;;  %240 = vst [vmem:[%s1270_s24 + $0x98] sm:$0xff] %v239_v19  ;;  %v243_v21 = vld [vmem:[%s1265_s23 + $0x150] sm:$0xff] }
  0x1f   : > { %242 = vst [vmem:[%s1270_s24 + $0xa0] sm:$0xff] %v241_v20  ;;  %v245_v22 = vld [vmem:[%s1265_s23 + $0x160] sm:$0xff]  ;;  %v247_v23 = vld [vmem:[%s1265_s23 + $0x170] sm:$0xff]  ;;  %244 = vst [vmem:[%s1270_s24 + $0xa8] sm:$0xff] %v243_v21 }
  0x20   : > { %246 = vst [vmem:[%s1270_s24 + $0xb0] sm:$0xff] %v245_v22  ;;  %248 = vst [vmem:[%s1270_s24 + $0xb8] sm:$0xff] %v247_v23  ;;  %v249_v24 = vld [vmem:[%s1265_s23 + $0x180] sm:$0xff]  ;;  %v251_v25 = vld [vmem:[%s1265_s23 + $0x190] sm:$0xff] }
  0x21   : > { %v253_v26 = vld [vmem:[%s1265_s23 + $0x1a0] sm:$0xff]  ;;  %250 = vst [vmem:[%s1270_s24 + $0xc0] sm:$0xff] %v249_v24  ;;  %252 = vst [vmem:[%s1270_s24 + $0xc8] sm:$0xff] %v251_v25  ;;  %v255_v27 = vld [vmem:[%s1265_s23 + $0x1b0] sm:$0xff] }
  0x22   : > { %254 = vst [vmem:[%s1270_s24 + $0xd0] sm:$0xff] %v253_v26  ;;  %v257_v28 = vld [vmem:[%s1265_s23 + $0x1c0] sm:$0xff]  ;;  %v259_v29 = vld [vmem:[%s1265_s23 + $0x1d0] sm:$0xff]  ;;  %256 = vst [vmem:[%s1270_s24 + $0xd8] sm:$0xff] %v255_v27 }
  0x23   : > { %258 = vst [vmem:[%s1270_s24 + $0xe0] sm:$0xff] %v257_v28  ;;  %260 = vst [vmem:[%s1270_s24 + $0xe8] sm:$0xff] %v259_v29  ;;  %v261_v30 = vld [vmem:[%s1265_s23 + $0x1e0] sm:$0xff]  ;;  %v263_v31 = vld [vmem:[%s1265_s23 + $0x1f0] sm:$0xff] }
  0x24   : > { %262 = vst [vmem:[%s1270_s24 + $0xf0] sm:$0xff] %v261_v30  ;;  %264 = vst [vmem:[%s1270_s24 + $0xf8] sm:$0xff] %v263_v31 }
  0x25 PF: > { %p1071_p7 = scmp.ge.s32.totalorder %s1207_s11, 1  ;;  %p269_p8 = scmp.lt.s32.totalorder %s1207_s11, 3 }
  0x27   : > { %p270_p9 = pnand %p1071_p7, %p269_p8 }
  0x28   : > { %s276_s25 = sand.u32 (!%p270_p9), 1, %s1199_s9   ;;  %v1209_v32 = vmov (!%p270_p9), 0   ;;  %v1106_v15 = vld [vmem:[%s1659_s0] ss:$0 sm:$0xff] (!%p270_p9)  ;;  %v1122_v18 = vld [vmem:[%s1659_s0 + $0x10] ss:$0 sm:$0xff] (!%p270_p9) }
  0x29   : > { %273 = sbr.rel (%p270_p9) target bundleno = 247 (0xf7), region = 62  ;;  %1184 = vset.pattern.permute.xlu1 (!%p270_p9), %v1209_v32  ;;  %1183 = vset.pattern.permute.xlu0 (!%p270_p9), %v1209_v32  ;;  %s1336_s26 = sshll.u32 (!%p270_p9), %s276_s25, 8  ;;  %v1107_v19 = vld [vmem:[%s1659_s0 + $0x1] ss:$0 sm:$0xff] (!%p270_p9)  ;;  %v1123_v20 = vld [vmem:[%s1659_s0 + $0x11] ss:$0 sm:$0xff] (!%p270_p9) }
  0x2a   : > { %s1339_s27 = scalar_lea.vmem (!%p270_p9), [#allocation2], %s1336_s26  ;;  %v1108_v21 = vld [vmem:[%s1659_s0 + $0x2] ss:$0 sm:$0xff] (!%p270_p9)  ;;  %v1124_v28 = vld [vmem:[%s1659_s0 + $0x12] ss:$0 sm:$0xff] (!%p270_p9)  ;;  %vm762_vm0 = vcmask (!%p270_p9), 130048  }
  0x2b   : > { %v1092_v33 = vld [vmem:[%s1339_s27 + $0x90] sm:$0xff] (!%p270_p9)  ;;  %v1090_v34 = vld [vmem:[%s1339_s27 + $0x80] sm:$0xff] (!%p270_p9)  ;;  %v1093_v35 = vld [vmem:[%s1339_s27 + $0x98] sm:$0xff] (!%p270_p9)  ;;  %s1430_s3 = scalar_lea.vmem (!%p270_p9), [#allocation3], %s1336_s26 }
  0x2c   : > { %470 = vperm.xlu1 (!%p270_p9), %1184, %v1092_v33   ;;  %460 = vperm.xlu0 (!%p270_p9), %1183, %v1090_v34   ;;  %v1091_v36 = vld [vmem:[%s1339_s27 + $0x88] sm:$0xff] (!%p270_p9)  ;;  %v1094_v38 = vld [vmem:[%s1339_s27 + $0xa0] sm:$0xff] (!%p270_p9)  ;;  %v1097_v39 = vld [vmem:[%s1339_s27 + $0xb8] sm:$0xff] (!%p270_p9) }
  0x2d   : > { %v1095_v37 = vld [vmem:[%s1339_s27 + $0xa8] sm:$0xff] (!%p270_p9)  ;;  %v1096_v40 = vld [vmem:[%s1339_s27 + $0xb0] sm:$0xff] (!%p270_p9)  ;;  %v1098_v42 = vld [vmem:[%s1339_s27 + $0xc0] sm:$0xff] (!%p270_p9) }
  0x2e   : > { %v1099_v41 = vld [vmem:[%s1339_s27 + $0xc8] sm:$0xff] (!%p270_p9)  ;;  %v1101_v43 = vld [vmem:[%s1339_s27 + $0xd8] sm:$0xff] (!%p270_p9)  ;;  %v1100_v44 = vld [vmem:[%s1339_s27 + $0xd0] sm:$0xff] (!%p270_p9) }
  0x2f   : > { %v1103_v45 = vld [vmem:[%s1339_s27 + $0xe8] sm:$0xff] (!%p270_p9)  ;;  %v1102_v46 = vld [vmem:[%s1339_s27 + $0xe0] sm:$0xff] (!%p270_p9)  ;;  %v1105_v47 = vld [vmem:[%s1339_s27 + $0xf8] sm:$0xff] (!%p270_p9) }
  0x30   : > { %475 = vperm.xlu1 %1184, %v1093_v35   ;;  %465 = vperm.xlu0 %1183, %v1091_v36   ;;  %v1104_v48 = vld [vmem:[%s1339_s27 + $0xf0] sm:$0xff]  ;;  %v330_v49 = vld [vmem:[%s1339_s27 + $0x8] sm:$0xff]  ;;  %v329_v50 = vld [vmem:[%s1339_s27] sm:$0xff]  ;;  %s1155_s29 = sshll.u32 (%p1255_p5), %s1065_s12, 3 }
  0x31   : > { %v332_v51 = vld [vmem:[%s1339_s27 + $0x18] sm:$0xff]  ;;  %v331_v52 = vld [vmem:[%s1339_s27 + $0x10] sm:$0xff]  ;;  %v334_v53 = vld [vmem:[%s1339_s27 + $0x28] sm:$0xff]  ;;  %s1586_s17 = scalar_lea.vmem (%p1255_p5), %s1661_s2, %s1155_s29 }
  0x32   : > { %v333_v54 = vld [vmem:[%s1339_s27 + $0x20] sm:$0xff]  ;;  %v336_v55 = vld [vmem:[%s1339_s27 + $0x38] sm:$0xff]  ;;  %v335_v56 = vld [vmem:[%s1339_s27 + $0x30] sm:$0xff] }
  0x33   : > { %v338_v57 = vld [vmem:[%s1339_s27 + $0x48] sm:$0xff]  ;;  %v337_v58 = vld [vmem:[%s1339_s27 + $0x40] sm:$0xff]  ;;  %v340_v59 = vld [vmem:[%s1339_s27 + $0x58] sm:$0xff] }
  0x34   : > { %485 = vperm.xlu1 %1184, %v1095_v37   ;;  %480 = vperm.xlu0 %1183, %v1094_v38   ;;  %v339_v60 = vld [vmem:[%s1339_s27 + $0x50] sm:$0xff]  ;;  %v342_v61 = vld [vmem:[%s1339_s27 + $0x68] sm:$0xff]  ;;  %v341_v62 = vld [vmem:[%s1339_s27 + $0x60] sm:$0xff] }
  0x35   : > { %v344_v63 = vld [vmem:[%s1339_s27 + $0x78] sm:$0xff]  ;;  %v343_v0 = vld [vmem:[%s1339_s27 + $0x70] sm:$0xff]  ;;  %v1109_v29 = vld [vmem:[%s1659_s0 + $0x3] ss:$0 sm:$0xff] }
  0x36   : > { %v1125_v30 = vld [vmem:[%s1659_s0 + $0x13] ss:$0 sm:$0xff] }
  0x38   : > { %495 = vperm.xlu1 %1184, %v1097_v39   ;;  %490 = vperm.xlu0 %1183, %v1096_v40  }
  0x3c   : > { %505 = vperm.xlu1 %1184, %v1099_v41   ;;  %500 = vperm.xlu0 %1183, %v1098_v42  }
  0x40   : > { %515 = vperm.xlu1 %1184, %v1101_v43   ;;  %510 = vperm.xlu0 %1183, %v1100_v44   ;;  %v1111_v43 = vld [vmem:[%s1659_s0 + $0x5] ss:$0 sm:$0xff] }
  0x44   : > { %525 = vperm.xlu1 %1184, %v1103_v45   ;;  %520 = vperm.xlu0 %1183, %v1102_v46   ;;  %v1127_v46 = vld [vmem:[%s1659_s0 + $0x15] ss:$0 sm:$0xff] }
  0x48   : > { %535 = vperm.xlu1 %1184, %v1105_v47   ;;  %530 = vperm.xlu0 %1183, %v1104_v48   ;;  %v1110_v47 = vld [vmem:[%s1659_s0 + $0x4] ss:$0 sm:$0xff]  ;;  %v1126_v48 = vld [vmem:[%s1659_s0 + $0x14] ss:$0 sm:$0xff] }
  0x4c   : > { %657 = vperm.xlu1 %1184, %v330_v49   ;;  %652 = vperm.xlu0 %1183, %v329_v50  }
  0x50   : > { %667 = vperm.xlu1 %1184, %v332_v51   ;;  %662 = vperm.xlu0 %1183, %v331_v52  }
  0x54   : > { %677 = vperm.xlu1 %1184, %v334_v53   ;;  %672 = vperm.xlu0 %1183, %v333_v54  }
  0x58   : > { %687 = vperm.xlu1 %1184, %v336_v55   ;;  %682 = vperm.xlu0 %1183, %v335_v56  }
  0x5c   : > { %697 = vperm.xlu1 %1184, %v338_v57   ;;  %692 = vperm.xlu0 %1183, %v337_v58  }
  0x60   : > { %707 = vperm.xlu1 %1184, %v340_v59   ;;  %702 = vperm.xlu0 %1183, %v339_v60  }
  0x64   : > { %717 = vperm.xlu1 %1184, %v342_v61   ;;  %712 = vperm.xlu0 %1183, %v341_v62   ;;  %v1113_v61 = vld [vmem:[%s1659_s0 + $0x7] ss:$0 sm:$0xff] }
  0x68   : > { %727 = vperm.xlu1 %1184, %v344_v63   ;;  %722 = vperm.xlu0 %1183, %v343_v0   ;;  %v1129_v0 = vld [vmem:[%s1659_s0 + $0x17] ss:$0 sm:$0xff] }
  0xab   : > { %v471_v1 = vpop.permute.xlu1 %470  ;;  %v461_v2 = vpop.permute.xlu0 %460 }
  0xac   : > { %v538_v22 = vmul.f32 %v1106_v15, %v461_v2  ;;  %v779_v23 = vmul.f32 %v1122_v18, %v461_v2  ;;  %v540_v39 = vmul.f32 %v1108_v21, %v471_v1  ;;  %v781_v40 = vmul.f32 %v1124_v28, %v471_v1  ;;  %v1112_v1 = vld [vmem:[%s1659_s0 + $0x6] ss:$0 sm:$0xff]  ;;  %v1128_v2 = vld [vmem:[%s1659_s0 + $0x16] ss:$0 sm:$0xff] }
  0xaf   : > { %v476_v3 = vpop.permute.xlu1 %475  ;;  %v466_v4 = vpop.permute.xlu0 %465 }
  0xb0   : > { %v539_v24 = vmul.f32 %v1107_v19, %v466_v4  ;;  %v780_v25 = vmul.f32 %v1123_v20, %v466_v4  ;;  %v541_v41 = vmul.f32 %v1109_v29, %v476_v3  ;;  %v782_v42 = vmul.f32 %v1125_v30, %v476_v3 }
  0xb3   : > { %v486_v5 = vpop.permute.xlu1 %485  ;;  %v481_v6 = vpop.permute.xlu0 %480 }
  0xb4   : > { %v543_v57 = vmul.f32 %v1111_v43, %v486_v5  ;;  %v784_v58 = vmul.f32 %v1127_v46, %v486_v5  ;;  %v542_v59 = vmul.f32 %v1110_v47, %v481_v6  ;;  %v783_v60 = vmul.f32 %v1126_v48, %v481_v6 }
  0xb7   : > { %v1373_v7 = vpop.permute.xlu1 %495  ;;  %v1375_v8 = vpop.permute.xlu0 %490 }
  0xbb   : > { %v1377_v9 = vpop.permute.xlu1 %505  ;;  %v1379_v10 = vpop.permute.xlu0 %500 }
  0xbf   : > { %v1381_v11 = vpop.permute.xlu1 %515  ;;  %v1383_v12 = vpop.permute.xlu0 %510 }
  0xc3   : > { %v1385_v13 = vpop.permute.xlu1 %525  ;;  %v1387_v14 = vpop.permute.xlu0 %520 }
  0xc7   : > { %v1392_v16 = vpop.permute.xlu1 %535  ;;  %v1394_v17 = vpop.permute.xlu0 %530 }
  0xcb   : > { %v658_v26 = vpop.permute.xlu1 %657  ;;  %v653_v27 = vpop.permute.xlu0 %652 }
  0xcc   : > { %v731_v31 = vmul.f32 %v1123_v20, %v658_v26  ;;  %v796_v32 = vmul.f32 %v1107_v19, %v658_v26  ;;  %v730_v33 = vmul.f32 %v1122_v18, %v653_v27  ;;  %v795_v34 = vmul.f32 %v1106_v15, %v653_v27 }
  0xce   : > { %v747_v35 = vadd.f32 %v731_v31, %v539_v24  ;;  %v812_v36 = vsub.f32 %v780_v25, %v796_v32  ;;  %v746_v37 = vadd.f32 %v730_v33, %v538_v22  ;;  %v811_v38 = vsub.f32 %v779_v23, %v795_v34  ;;  %v1115_v25 = vld [vmem:[%s1659_s0 + $0x9] ss:$0 sm:$0xff] }
  0xcf   : > { %v668_v44 = vpop.permute.xlu1 %667  ;;  %v663_v45 = vpop.permute.xlu0 %662  ;;  %v786_v22 = vmul.f32 %v1129_v0, %v1373_v7  ;;  %v544_v23 = vmul.f32 %v1112_v1, %v1375_v8  ;;  %v785_v24 = vmul.f32 %v1128_v2, %v1375_v8 }
  0xd0   : > { %764 = vst.msk [vmem:[%s1430_s3 + $0x8] sm:$0xff] %vm762_vm0, %v747_v35  ;;  %1139 = vst.msk [vmem:[%s1430_s3 + $0x88] sm:$0xff] %vm762_vm0, %v812_v36  ;;  %v733_v49 = vmul.f32 %v1125_v30, %v668_v44  ;;  %v798_v50 = vmul.f32 %v1109_v29, %v668_v44  ;;  %v732_v51 = vmul.f32 %v1124_v28, %v663_v45  ;;  %v1131_v28 = vld [vmem:[%s1659_s0 + $0x19] ss:$0 sm:$0xff]  ;;  %v1114_v29 = vld [vmem:[%s1659_s0 + $0x8] ss:$0 sm:$0xff] }
  0xd1   : > { %763 = vst.msk [vmem:[%s1430_s3] sm:$0xff] %vm762_vm0, %v746_v37  ;;  %1138 = vst.msk [vmem:[%s1430_s3 + $0x80] sm:$0xff] %vm762_vm0, %v811_v38  ;;  %v797_v52 = vmul.f32 %v1108_v21, %v663_v45  ;;  %v545_v21 = vmul.f32 %v1113_v61, %v1373_v7  ;;  %v1130_v7 = vld [vmem:[%s1659_s0 + $0x18] ss:$0 sm:$0xff]  ;;  %v547_v37 = vmul.f32 %v1115_v25, %v1377_v9  ;;  %v1133_v44 = vld [vmem:[%s1659_s0 + $0x1b] ss:$0 sm:$0xff] }
  0xd2   : > { %v749_v53 = vadd.f32 %v733_v49, %v541_v41  ;;  %v814_v54 = vsub.f32 %v782_v42, %v798_v50  ;;  %v748_v55 = vadd.f32 %v732_v51, %v540_v39  ;;  %v788_v38 = vmul.f32 %v1131_v28, %v1377_v9  ;;  %v1117_v41 = vld [vmem:[%s1659_s0 + $0xb] ss:$0 sm:$0xff]  ;;  %v1116_v45 = vld [vmem:[%s1659_s0 + $0xa] ss:$0 sm:$0xff]  ;;  %v1132_v9 = vld [vmem:[%s1659_s0 + $0x1a] ss:$0 sm:$0xff] }
  0xd3   : > { %v813_v56 = vsub.f32 %v781_v40, %v797_v52  ;;  %v678_v62 = vpop.permute.xlu1 %677  ;;  %v673_v63 = vpop.permute.xlu0 %672  ;;  %v546_v39 = vmul.f32 %v1114_v29, %v1379_v10  ;;  %v787_v40 = vmul.f32 %v1130_v7, %v1379_v10 }
  0xd4   : > { %766 = vst.msk [vmem:[%s1430_s3 + $0x18] sm:$0xff] %vm762_vm0, %v749_v53  ;;  %1141 = vst.msk [vmem:[%s1430_s3 + $0x98] sm:$0xff] %vm762_vm0, %v814_v54  ;;  %v735_v3 = vmul.f32 %v1127_v46, %v678_v62  ;;  %v800_v4 = vmul.f32 %v1111_v43, %v678_v62  ;;  %v734_v5 = vmul.f32 %v1126_v48, %v673_v63 }
  0xd5   : > { %765 = vst.msk [vmem:[%s1430_s3 + $0x10] sm:$0xff] %vm762_vm0, %v748_v55  ;;  %1140 = vst.msk [vmem:[%s1430_s3 + $0x90] sm:$0xff] %vm762_vm0, %v813_v56  ;;  %v799_v6 = vmul.f32 %v1110_v47, %v673_v63  ;;  %v549_v53 = vmul.f32 %v1117_v41, %v1381_v11  ;;  %v790_v54 = vmul.f32 %v1133_v44, %v1381_v11  ;;  %v1134_v11 = vld [vmem:[%s1659_s0 + $0x1c] ss:$0 sm:$0xff] }
  0xd6   : > { %v751_v15 = vadd.f32 %v735_v3, %v543_v57  ;;  %v816_v18 = vsub.f32 %v784_v58, %v800_v4  ;;  %v750_v19 = vadd.f32 %v734_v5, %v542_v59  ;;  %v548_v55 = vmul.f32 %v1116_v45, %v1383_v12  ;;  %v1119_v57 = vld [vmem:[%s1659_s0 + $0xd] ss:$0 sm:$0xff] }
  0xd7   : > { %v815_v20 = vsub.f32 %v783_v60, %v799_v6  ;;  %v688_v26 = vpop.permute.xlu1 %687  ;;  %v683_v27 = vpop.permute.xlu0 %682  ;;  %v789_v56 = vmul.f32 %v1132_v9, %v1383_v12  ;;  %v1135_v60 = vld [vmem:[%s1659_s0 + $0x1d] ss:$0 sm:$0xff]  ;;  %v551_v5 = vmul.f32 %v1119_v57, %v1385_v13 }
  0xd8   : > { %768 = vst.msk [vmem:[%s1430_s3 + $0x28] sm:$0xff] %vm762_vm0, %v751_v15  ;;  %1143 = vst.msk [vmem:[%s1430_s3 + $0xa8] sm:$0xff] %vm762_vm0, %v816_v18  ;;  %v737_v8 = vmul.f32 %v1129_v0, %v688_v26  ;;  %v802_v30 = vmul.f32 %v1113_v61, %v688_v26  ;;  %v736_v31 = vmul.f32 %v1128_v2, %v683_v27  ;;  %v1118_v61 = vld [vmem:[%s1659_s0 + $0xc] ss:$0 sm:$0xff]  ;;  %v1136_v26 = vld [vmem:[%s1659_s0 + $0x1e] ss:$0 sm:$0xff] }
  0xd9   : > { %767 = vst.msk [vmem:[%s1430_s3 + $0x20] sm:$0xff] %vm762_vm0, %v750_v19  ;;  %1142 = vst.msk [vmem:[%s1430_s3 + $0xa0] sm:$0xff] %vm762_vm0, %v815_v20  ;;  %v801_v32 = vmul.f32 %v1112_v1, %v683_v27  ;;  %v792_v6 = vmul.f32 %v1135_v60, %v1385_v13  ;;  %v550_v15 = vmul.f32 %v1118_v61, %v1387_v14 }
  0xda   : > { %v753_v33 = vadd.f32 %v737_v8, %v545_v21  ;;  %v818_v34 = vsub.f32 %v786_v22, %v802_v30  ;;  %v752_v35 = vadd.f32 %v736_v31, %v544_v23  ;;  %v791_v18 = vmul.f32 %v1134_v11, %v1387_v14  ;;  %v1121_v21 = vld [vmem:[%s1659_s0 + $0xf] ss:$0 sm:$0xff] }
  0xdb   : > { %v817_v36 = vsub.f32 %v785_v24, %v801_v32  ;;  %v698_v42 = vpop.permute.xlu1 %697  ;;  %v693_v43 = vpop.permute.xlu0 %692  ;;  %v1137_v24 = vld [vmem:[%s1659_s0 + $0x1f] ss:$0 sm:$0xff]  ;;  %v553_v8 = vmul.f32 %v1121_v21, %v1392_v16 }
  0xdc   : > { %770 = vst.msk [vmem:[%s1430_s3 + $0x38] sm:$0xff] %vm762_vm0, %v753_v33  ;;  %1145 = vst.msk [vmem:[%s1430_s3 + $0xb8] sm:$0xff] %vm762_vm0, %v818_v34  ;;  %v739_v10 = vmul.f32 %v1131_v28, %v698_v42  ;;  %v804_v46 = vmul.f32 %v1115_v25, %v698_v42  ;;  %v738_v47 = vmul.f32 %v1130_v7, %v693_v43  ;;  %v1120_v25 = vld [vmem:[%s1659_s0 + $0xe] ss:$0 sm:$0xff] }
  0xdd   : > { %769 = vst.msk [vmem:[%s1430_s3 + $0x30] sm:$0xff] %vm762_vm0, %v752_v35  ;;  %1144 = vst.msk [vmem:[%s1430_s3 + $0xb0] sm:$0xff] %vm762_vm0, %v817_v36  ;;  %v803_v48 = vmul.f32 %v1114_v29, %v693_v43  ;;  %v794_v30 = vmul.f32 %v1137_v24, %v1392_v16  ;;  %v552_v32 = vmul.f32 %v1120_v25, %v1394_v17  ;;  %v944_v42 = vld [vmem:[%s1430_s3 + $0x8] sm:$0xff] (%p1255_p5)  ;;  %v946_v43 = vld [vmem:[%s1430_s3 + $0x10] sm:$0xff] (%p1255_p5) }
  0xde   : > { %v755_v49 = vadd.f32 %v739_v10, %v547_v37  ;;  %v820_v50 = vsub.f32 %v788_v38, %v804_v46  ;;  %v754_v51 = vadd.f32 %v738_v47, %v546_v39  ;;  %v793_v33 = vmul.f32 %v1136_v26, %v1394_v17  ;;  %v942_v17 = vld [vmem:[%s1430_s3] sm:$0xff] (%p1255_p5)  ;;  %945 = vst [vmem:[%s1586_s17 + $0x10] sm:$0xff] (%p1255_p5), %v944_v42 }
  0xdf   : > { %v819_v52 = vsub.f32 %v787_v40, %v803_v48  ;;  %v708_v58 = vpop.permute.xlu1 %707  ;;  %v703_v59 = vpop.permute.xlu0 %702  ;;  %943 = vst [vmem:[%s1586_s17] sm:$0xff] (%p1255_p5), %v942_v17  ;;  %947 = vst [vmem:[%s1586_s17 + $0x20] sm:$0xff] (%p1255_p5), %v946_v43 }
  0xe0   : > { %772 = vst.msk [vmem:[%s1430_s3 + $0x48] sm:$0xff] %vm762_vm0, %v755_v49  ;;  %1147 = vst.msk [vmem:[%s1430_s3 + $0xc8] sm:$0xff] %vm762_vm0, %v820_v50  ;;  %v741_v12 = vmul.f32 %v1133_v44, %v708_v58  ;;  %v806_v62 = vmul.f32 %v1117_v41, %v708_v58  ;;  %v740_v63 = vmul.f32 %v1132_v9, %v703_v59  ;;  %v948_v44 = vld [vmem:[%s1430_s3 + $0x18] sm:$0xff] (%p1255_p5)  ;;  %v952_v9 = vld [vmem:[%s1430_s3 + $0x28] sm:$0xff] (%p1255_p5) }
  0xe1   : > { %771 = vst.msk [vmem:[%s1430_s3 + $0x40] sm:$0xff] %vm762_vm0, %v754_v51  ;;  %1146 = vst.msk [vmem:[%s1430_s3 + $0xc0] sm:$0xff] %vm762_vm0, %v819_v52  ;;  %v805_v0 = vmul.f32 %v1116_v45, %v703_v59  ;;  %v950_v45 = vld [vmem:[%s1430_s3 + $0x20] sm:$0xff] (%p1255_p5)  ;;  %v980_v58 = vld [vmem:[%s1430_s3 + $0x98] sm:$0xff] (%p1255_p5) }
  0xe2   : > { %v757_v1 = vadd.f32 %v741_v12, %v549_v53  ;;  %v822_v2 = vsub.f32 %v790_v54, %v806_v62  ;;  %v756_v3 = vadd.f32 %v740_v63, %v548_v55  ;;  %949 = vst [vmem:[%s1586_s17 + $0x30] sm:$0xff] (%p1255_p5), %v948_v44  ;;  %951 = vst [vmem:[%s1586_s17 + $0x40] sm:$0xff] (%p1255_p5), %v950_v45  ;;  %v974_v55 = vld [vmem:[%s1430_s3 + $0x80] sm:$0xff] (%p1255_p5) }
  0xe3   : > { %v821_v4 = vsub.f32 %v789_v56, %v805_v0  ;;  %v718_v19 = vpop.permute.xlu1 %717  ;;  %v713_v20 = vpop.permute.xlu0 %712  ;;  %953 = vst [vmem:[%s1586_s17 + $0x50] sm:$0xff] (%p1255_p5), %v952_v9  ;;  %v956_v46 = vld [vmem:[%s1430_s3 + $0x38] sm:$0xff] (%p1255_p5)  ;;  %v976_v56 = vld [vmem:[%s1430_s3 + $0x88] sm:$0xff] (%p1255_p5)  ;;  %975 = vst [vmem:[%s1586_s17 + $0x100] sm:$0xff] (%p1255_p5), %v974_v55 }
  0xe4   : > { %774 = vst.msk [vmem:[%s1430_s3 + $0x58] sm:$0xff] %vm762_vm0, %v757_v1  ;;  %1149 = vst.msk [vmem:[%s1430_s3 + $0xd8] sm:$0xff] %vm762_vm0, %v822_v2  ;;  %v743_v22 = vmul.f32 %v1135_v60, %v718_v19  ;;  %v808_v13 = vmul.f32 %v1119_v57, %v718_v19  ;;  %v742_v23 = vmul.f32 %v1134_v11, %v713_v20  ;;  %v954_v10 = vld [vmem:[%s1430_s3 + $0x30] sm:$0xff] (%p1255_p5)  ;;  %v982_v59 = vld [vmem:[%s1430_s3 + $0xa0] sm:$0xff] (%p1255_p5) }
  0xe5   : > { %773 = vst.msk [vmem:[%s1430_s3 + $0x50] sm:$0xff] %vm762_vm0, %v756_v3  ;;  %1148 = vst.msk [vmem:[%s1430_s3 + $0xd0] sm:$0xff] %vm762_vm0, %v821_v4  ;;  %v807_v14 = vmul.f32 %v1118_v61, %v713_v20  ;;  %v978_v57 = vld [vmem:[%s1430_s3 + $0x90] sm:$0xff] (%p1255_p5)  ;;  %v984_v60 = vld [vmem:[%s1430_s3 + $0xa8] sm:$0xff] (%p1255_p5) }
  0xe6   : > { %v759_v27 = vadd.f32 %v743_v22, %v551_v5  ;;  %v824_v28 = vsub.f32 %v792_v6, %v808_v13  ;;  %v758_v29 = vadd.f32 %v742_v23, %v550_v15  ;;  %955 = vst [vmem:[%s1586_s17 + $0x60] sm:$0xff] (%p1255_p5), %v954_v10  ;;  %957 = vst [vmem:[%s1586_s17 + $0x70] sm:$0xff] (%p1255_p5), %v956_v46  ;;  %v986_v61 = vld [vmem:[%s1430_s3 + $0xb0] sm:$0xff] (%p1255_p5)  ;;  %v988_v11 = vld [vmem:[%s1430_s3 + $0xb8] sm:$0xff] (%p1255_p5) }
  0xe7   : > { %v823_v7 = vsub.f32 %v791_v18, %v807_v14  ;;  %v728_v31 = vpop.permute.xlu1 %727  ;;  %v723_v34 = vpop.permute.xlu0 %722  ;;  %850 = sbr.rel (!%p1255_p5) target bundleno = 247 (0xf7), region = 70  ;;  %v960_v48 = vld [vmem:[%s1430_s3 + $0x48] sm:$0xff] (%p1255_p5)  ;;  %977 = vst [vmem:[%s1586_s17 + $0x110] sm:$0xff] (%p1255_p5), %v976_v56  ;;  %979 = vst [vmem:[%s1586_s17 + $0x120] sm:$0xff] (%p1255_p5), %v978_v57 }
  0xe8   : > { %776 = vst.msk [vmem:[%s1430_s3 + $0x68] sm:$0xff] %vm762_vm0, %v759_v27  ;;  %1151 = vst.msk [vmem:[%s1430_s3 + $0xe8] sm:$0xff] %vm762_vm0, %v824_v28  ;;  %v745_v35 = vmul.f32 %v1137_v24, %v728_v31  ;;  %v810_v16 = vmul.f32 %v1121_v21, %v728_v31  ;;  %v744_v36 = vmul.f32 %v1136_v26, %v723_v34  ;;  %v958_v47 = vld [vmem:[%s1430_s3 + $0x40] sm:$0xff] (%p1255_p5)  ;;  %v992_v62 = vld [vmem:[%s1430_s3 + $0xc8] sm:$0xff] (%p1255_p5) }
  0xe9   : > { %775 = vst.msk [vmem:[%s1430_s3 + $0x60] sm:$0xff] %vm762_vm0, %v758_v29  ;;  %1150 = vst.msk [vmem:[%s1430_s3 + $0xe0] sm:$0xff] %vm762_vm0, %v823_v7  ;;  %v809_v37 = vmul.f32 %v1120_v25, %v723_v34  ;;  %v990_v12 = vld [vmem:[%s1430_s3 + $0xc0] sm:$0xff] (%p1255_p5) }
  0xea   : > { %v761_v38 = vadd.f32 %v745_v35, %v553_v8  ;;  %v826_v39 = vsub.f32 %v794_v30, %v810_v16  ;;  %v760_v40 = vadd.f32 %v744_v36, %v552_v32  ;;  %959 = vst [vmem:[%s1586_s17 + $0x80] sm:$0xff] (%p1255_p5), %v958_v47  ;;  %961 = vst [vmem:[%s1586_s17 + $0x90] sm:$0xff] (%p1255_p5), %v960_v48 }
  0xeb   : > { %v825_v41 = vsub.f32 %v793_v33, %v809_v37  ;;  %v964_v50 = vld [vmem:[%s1430_s3 + $0x58] sm:$0xff] (%p1255_p5)  ;;  %981 = vst [vmem:[%s1586_s17 + $0x130] sm:$0xff] (%p1255_p5), %v980_v58  ;;  %983 = vst [vmem:[%s1586_s17 + $0x140] sm:$0xff] (%p1255_p5), %v982_v59 }
  0xec   : > { %778 = vst.msk [vmem:[%s1430_s3 + $0x78] sm:$0xff] %vm762_vm0, %v761_v38  ;;  %1153 = vst.msk [vmem:[%s1430_s3 + $0xf8] sm:$0xff] %vm762_vm0, %v826_v39  ;;  %v962_v49 = vld [vmem:[%s1430_s3 + $0x50] sm:$0xff] (%p1255_p5)  ;;  %v996_v0 = vld [vmem:[%s1430_s3 + $0xd8] sm:$0xff] (%p1255_p5) }
  0xed   : > { %777 = vst.msk [vmem:[%s1430_s3 + $0x70] sm:$0xff] %vm762_vm0, %v760_v40  ;;  %1152 = vst.msk [vmem:[%s1430_s3 + $0xf0] sm:$0xff] %vm762_vm0, %v825_v41  ;;  %v994_v63 = vld [vmem:[%s1430_s3 + $0xd0] sm:$0xff] (%p1255_p5) }
  0xee   : > { %963 = vst [vmem:[%s1586_s17 + $0xa0] sm:$0xff] %v962_v49  ;;  %965 = vst [vmem:[%s1586_s17 + $0xb0] sm:$0xff] %v964_v50 }
  0xef   : > { %v968_v52 = vld [vmem:[%s1430_s3 + $0x68] sm:$0xff]  ;;  %985 = vst [vmem:[%s1586_s17 + $0x150] sm:$0xff] %v984_v60  ;;  %987 = vst [vmem:[%s1586_s17 + $0x160] sm:$0xff] %v986_v61 }
  0xf0   : > { %v966_v51 = vld [vmem:[%s1430_s3 + $0x60] sm:$0xff]  ;;  %969 = vst [vmem:[%s1586_s17 + $0xd0] sm:$0xff] %v968_v52  ;;  %989 = vst [vmem:[%s1586_s17 + $0x170] sm:$0xff] %v988_v11  ;;  %v1000_v2 = vld [vmem:[%s1430_s3 + $0xe8] sm:$0xff] }
  0xf1   : > { %967 = vst [vmem:[%s1586_s17 + $0xc0] sm:$0xff] %v966_v51  ;;  %991 = vst [vmem:[%s1586_s17 + $0x180] sm:$0xff] %v990_v12  ;;  %v998_v1 = vld [vmem:[%s1430_s3 + $0xe0] sm:$0xff] }
  0xf2   : > { %993 = vst [vmem:[%s1586_s17 + $0x190] sm:$0xff] %v992_v62  ;;  %995 = vst [vmem:[%s1586_s17 + $0x1a0] sm:$0xff] %v994_v63 }
  0xf3   : > { %v972_v54 = vld [vmem:[%s1430_s3 + $0x78] sm:$0xff]  ;;  %997 = vst [vmem:[%s1586_s17 + $0x1b0] sm:$0xff] %v996_v0  ;;  %999 = vst [vmem:[%s1586_s17 + $0x1c0] sm:$0xff] %v998_v1 }
  0xf4   : > { %v970_v53 = vld [vmem:[%s1430_s3 + $0x70] sm:$0xff]  ;;  %973 = vst [vmem:[%s1586_s17 + $0xf0] sm:$0xff] %v972_v54  ;;  %1001 = vst [vmem:[%s1586_s17 + $0x1d0] sm:$0xff] %v1000_v2  ;;  %v1004_v4 = vld [vmem:[%s1430_s3 + $0xf8] sm:$0xff] }
  0xf5   : > { %971 = vst [vmem:[%s1586_s17 + $0xe0] sm:$0xff] %v970_v53  ;;  %v1002_v3 = vld [vmem:[%s1430_s3 + $0xf0] sm:$0xff]  ;;  %1005 = vst [vmem:[%s1586_s17 + $0x1f0] sm:$0xff] %v1004_v4 }
  0xf6   : > { %1003 = vst [vmem:[%s1586_s17 + $0x1e0] sm:$0xff] %v1002_v3 }
  0xf7 PF: > { %p9_p10 = scmp.ge.s32.totalorder %s1242_s13, 4   ;;  %s1663_s9 = smov %s1203_s10 }
  0xf8   : > { %s1664_s10 = smov %s1253_s16  ;;  %s1665_s11 = smov %s1242_s13 }
  0xf9   :  { %11 = sbr.rel (!%p9_p10) target bundleno = 2 (0x2), region = 142 }

</bundles_post_ra>
